<compile_context>
chip_gen: v5e
topology: v5e:2x2
jax: 0.10.0
libtpu: 0.0.40
codegen_flags: <defaults>
</compile_context>

<pallas_src>
import functools

import jax
import jax.numpy as jnp
from jax import lax
from jax.experimental import pallas as pl
from jax.experimental.pallas import tpu as pltpu


def _value_net_kernel(x_ref, w1_ref, b1_ref, w2_ref, b2_ref, out_ref, *, chunk):
    # x_ref : [TB, S]   batch on sublanes (torch-native layout, no host transpose)
    # w1_ref: [H, S]    torch fc1.weight layout
    # b1_ref: [1, H]
    # w2_ref: [1, H]    torch fc2.weight layout
    # b2_ref: [1, 1]    SMEM scalar
    # out   : [TB, 1]
    tb = x_ref.shape[0]
    w1_v = w1_ref[...]          # [H, S]
    b1_row = b1_ref[...]        # [1, H] -> broadcasts over sublanes (batch)
    w2_row = w2_ref[...]        # [1, H]
    b2 = b2_ref[0, 0]

    # Chunk the batch rows so the fc1 activation stays in registers
    # (<= 32 vregs per chunk) instead of being staged through VMEM.
    for s0 in range(0, tb, chunk):
        c = min(chunk, tb - s0)
        xk = x_ref[s0:s0 + c, :]                                  # [c, S]
        # fc1 on the MXU: xk @ w1.T expressed via dimension numbers, so the
        # transpose of the tiny weight is never materialized.
        hk = lax.dot_general(xk, w1_v, (((1,), (1,)), ((), ())),
                             preferred_element_type=jnp.float32)  # [c, H]
        hk = jnp.maximum(hk + b1_row, 0.0)                        # bias + ReLU
        # fc2 as a VPU multiply + lane reduction (not an N=1 MXU matmul).
        vk = jnp.sum(hk * w2_row, axis=-1, keepdims=True) + b2    # [c, 1]
        out_ref[s0:s0 + c, :] = vk.astype(out_ref.dtype)


def value_net(x, w1, b1, w2, b2, *, block_b=8192, chunk=256):
    """PPO ValueNet forward: relu(x @ w1.T + b1) @ w2.T + b2.

    Torch-native parameter layouts (passed through unchanged):
      x: [B, S]   w1: [H, S]   b1: [H]   w2: [1, H]   b2: [1]
    Returns [B, 1] float32.
    """
    B, S = x.shape
    H = w1.shape[0]

    # Only free, layout-preserving reshapes of the tiny parameters; x is
    # passed straight through (no transpose, no cast).
    b1_r = b1.reshape(1, H)
    w2_r = w2.reshape(1, H)
    b2_r = b2.reshape(1, 1)

    kernel = functools.partial(_value_net_kernel, chunk=chunk)

    vmem = pltpu.MemorySpace.VMEM
    smem = pltpu.MemorySpace.SMEM
    vmem_limit = 32 * 1024 * 1024   # fits v5e/v6e/v7x scoped-VMEM budgets

    if B <= block_b:
        # Rollout / episode-sized batches: single invocation, full-array
        # blocks, no grid -> no pipeline scaffolding, one launch total.
        out = pl.pallas_call(
            kernel,
            out_shape=jax.ShapeDtypeStruct((B, 1), jnp.float32),
            in_specs=[
                pl.BlockSpec(memory_space=vmem),   # x   [B, S]
                pl.BlockSpec(memory_space=vmem),   # w1  [H, S]
                pl.BlockSpec(memory_space=vmem),   # b1  [1, H]
                pl.BlockSpec(memory_space=vmem),   # w2  [1, H]
                pl.BlockSpec(memory_space=smem),   # b2  [1, 1] scalar
            ],
            out_specs=pl.BlockSpec(memory_space=vmem),
            compiler_params=pltpu.CompilerParams(vmem_limit_bytes=vmem_limit),
        )(x, w1, b1_r, w2_r, b2_r)
    else:
        # Large PPO minibatches: tile the batch (sublane) axis with big tiles
        # to amortize per-grid-step overhead; weights stay resident.
        tb = block_b
        out = pl.pallas_call(
            kernel,
            out_shape=jax.ShapeDtypeStruct((B, 1), jnp.float32),
            grid=(pl.cdiv(B, tb),),
            in_specs=[
                pl.BlockSpec((tb, S), lambda i: (i, 0)),   # x tile
                pl.BlockSpec((H, S), lambda i: (0, 0)),    # w1 resident
                pl.BlockSpec((1, H), lambda i: (0, 0)),    # b1 resident
                pl.BlockSpec((1, H), lambda i: (0, 0)),    # w2 resident
                pl.BlockSpec(memory_space=smem),           # b2 scalar in SMEM
            ],
            out_specs=pl.BlockSpec((tb, 1), lambda i: (i, 0)),
            compiler_params=pltpu.CompilerParams(
                # Independent batch tiles: lets v7x's two TensorCores split
                # the grid; near-neutral on single-TC v5e/v6e.
                dimension_semantics=("parallel",),
                vmem_limit_bytes=vmem_limit,
            ),
        )(x, w1, b1_r, w2_r, b2_r)

    # Ragged last grid tile (B % block_b != 0) is benign: out-of-bounds rows
    # compute garbage that is never written back to the logical output, and
    # every output row depends only on its own input row.
    return out


def reference(x, w1, b1, w2, b2):
    h = jnp.maximum(jnp.dot(x, w1.T, precision="highest") + b1, 0.0)
    return jnp.dot(h, w2.T, precision="highest") + b2


if __name__ == "__main__":
    # CartPole-v1: state_dim = 4; hidden_dim = 128 (as in the module).
    state_dim = 4
    hidden_dim = 128

    key = jax.random.PRNGKey(0)
    kx1, kx2, kx3, k1, k2, k3, k4 = jax.random.split(key, 7)

    # torch.nn.Linear-shaped deterministic synthetic parameters.
    w1 = jax.random.normal(k1, (hidden_dim, state_dim), dtype=jnp.float32) * 0.1
    b1 = jax.random.normal(k2, (hidden_dim,), dtype=jnp.float32) * 0.1
    w2 = jax.random.normal(k3, (1, hidden_dim), dtype=jnp.float32) * 0.1
    b2 = jax.random.normal(k4, (1,), dtype=jnp.float32) * 0.1

    # Rollout-sized batch: single launch, no grid.
    x_small = jax.random.normal(kx1, (8, state_dim), dtype=jnp.float32)
    out_small = jax.block_until_ready(value_net(x_small, w1, b1, w2, b2))
    ref_small = reference(x_small, w1, b1, w2, b2)
    assert out_small.shape == (8, 1), out_small.shape
    assert jnp.allclose(out_small, ref_small, atol=1e-5, rtol=1e-5)

    # Episode-sized batch (typical PPO update for CartPole): still one
    # invocation; exercises the in-kernel chunk remainder path.
    x_mid = jax.random.normal(kx2, (500, state_dim), dtype=jnp.float32)
    out_mid = jax.block_until_ready(value_net(x_mid, w1, b1, w2, b2))
    ref_mid = reference(x_mid, w1, b1, w2, b2)
    assert out_mid.shape == (500, 1), out_mid.shape
    assert jnp.allclose(out_mid, ref_mid, atol=1e-4, rtol=1e-4)

    # Large minibatch: exercises the gridded path, including a ragged last tile.
    x_big = jax.random.normal(kx3, (12000, state_dim), dtype=jnp.float32)
    out_big = jax.block_until_ready(value_net(x_big, w1, b1, w2, b2))
    ref_big = reference(x_big, w1, b1, w2, b2)
    assert out_big.shape == (12000, 1), out_big.shape
    assert jnp.allclose(out_big, ref_big, atol=1e-4, rtol=1e-4)

    print("KERNEL_OK")
</pallas_src>

<mosaic_0001>
module attributes {stable_mosaic.version = 11 : i64} {
  func.func @_value_net_kernel(%arg0: memref<8x4xf32, #tpu.memory_space<vmem>>, %arg1: memref<128x4xf32, #tpu.memory_space<vmem>>, %arg2: memref<1x128xf32, #tpu.memory_space<vmem>>, %arg3: memref<1x128xf32, #tpu.memory_space<vmem>>, %arg4: memref<1x1xf32, #tpu.memory_space<smem>>, %arg5: memref<8x1xf32, #tpu.memory_space<vmem>>) attributes {dimension_semantics = [], scalar_prefetch = 0 : i64, scratch_operands = 0 : i64, tpu.core_type = #tpu.core_type<tc>} {
    %c0 = arith.constant 0 : index
    %c0_0 = arith.constant 0 : index
    %0 = vector.load %arg1[%c0, %c0_0] : memref<128x4xf32, #tpu.memory_space<vmem>>, vector<128x4xf32>
    %c0_1 = arith.constant 0 : index
    %c0_2 = arith.constant 0 : index
    %1 = vector.load %arg2[%c0_1, %c0_2] : memref<1x128xf32, #tpu.memory_space<vmem>>, vector<1x128xf32>
    %c0_3 = arith.constant 0 : index
    %c0_4 = arith.constant 0 : index
    %2 = vector.load %arg3[%c0_3, %c0_4] : memref<1x128xf32, #tpu.memory_space<vmem>>, vector<1x128xf32>
    %c0_5 = arith.constant 0 : index
    %c0_6 = arith.constant 0 : index
    %3 = memref.load %arg4[%c0_5, %c0_6] : memref<1x1xf32, #tpu.memory_space<smem>>
    %c0_7 = arith.constant 0 : index
    %c0_8 = arith.constant 0 : index
    %4 = vector.load %arg0[%c0_7, %c0_8] : memref<8x4xf32, #tpu.memory_space<vmem>>, vector<8x4xf32>
    %cst = arith.constant dense<0.000000e+00> : vector<8x128xf32>
    %5 = tpu.matmul %4, %0, %cst {dimension_numbers = #tpu.dot_dimension_numbers<[1], [1], [0], [0], [0, 0, 1, 0], [], []>} : vector<8x4xf32>, vector<128x4xf32>, vector<8x128xf32> -> vector<8x128xf32>
    %6 = vector.broadcast %1 : vector<1x128xf32> to vector<8x128xf32>
    %7 = arith.addf %5, %6 : vector<8x128xf32>
    %cst_9 = arith.constant 0.000000e+00 : f32
    %8 = vector.broadcast %cst_9 : f32 to vector<8x128xf32>
    %9 = arith.maximumf %7, %8 : vector<8x128xf32>
    %10 = vector.broadcast %2 : vector<1x128xf32> to vector<8x128xf32>
    %11 = arith.mulf %9, %10 : vector<8x128xf32>
    %cst_10 = arith.constant dense<0.000000e+00> : vector<8xf32>
    %12 = vector.multi_reduction <add>, %11, %cst_10 [1] : vector<8x128xf32> to vector<8xf32>
    %13 = vector.shape_cast %12 : vector<8xf32> to vector<8x1xf32>
    %14 = vector.broadcast %3 : f32 to vector<8x1xf32>
    %15 = arith.addf %13, %14 : vector<8x1xf32>
    %c0_11 = arith.constant 0 : index
    %c0_12 = arith.constant 0 : index
    %16 = vector.load %arg5[%c0_11, %c0_12] : memref<8x1xf32, #tpu.memory_space<vmem>>, vector<8x1xf32>
    tpu.vector_store %arg5[%c0_11, %c0_12], %15 {strides = array<i32>} : memref<8x1xf32, #tpu.memory_space<vmem>>, vector<8x1xf32>,
    return
  }
}

</mosaic_0001>

<bundles_post_ra>
// kernel: tpu_custom_call.1
= control target key start
LH: loop header
LB: loop body
LE: loop exit
PB: predicated region body
PF: predicated region fallthrough
CT: control target
= control target key end

     0   :  { %vm44_vm0 = vcmask 31744   ;;  %vm125_vm1 = vcmask 7168   ;;  %s260_s1 = inlined_call_operand.vmem [shape: f32[128,4], index: 1, kind: input, shape index: {}]   ;;  %s261_s2 = inlined_call_operand.vmem [shape: f32[1,128], index: 2, kind: input, shape index: {}]   ;;  %s262_s0 = inlined_call_operand.vmem [shape: f32[8,4], index: 0, kind: input, shape index: {}]   ;;  %s263_s3 = inlined_call_operand.vmem [shape: f32[1,128], index: 3, kind: input, shape index: {}]   ;;  %s264_s4 = inlined_call_operand.<no memory space> [shape: f32[1,1], index: 4, kind: input, shape index: {}]   ;;  %s265_s5 = inlined_call_operand.vmem [shape: f32[8,1], index: 5, kind: output, shape index: {}]  }
   0x1   :  { %v36_v0 = vld [vmem:[%s260_s1 + $0x78] sm:$0xff]  ;;  %v35_v1 = vld [vmem:[%s260_s1 + $0x70] sm:$0xff]  ;;  %v34_v2 = vld [vmem:[%s260_s1 + $0x68] sm:$0xff]  ;;  %v123_v23 = vstv %s264_s4 }
   0x2   :  { %131 = vmatpush.xpose.msk.msra.mxu0 %vm44_vm0, %v36_v0  ;;  %v33_v3 = vld [vmem:[%s260_s1 + $0x60] sm:$0xff]  ;;  %v32_v4 = vld [vmem:[%s260_s1 + $0x58] sm:$0xff]  ;;  %v31_v5 = vld [vmem:[%s260_s1 + $0x50] sm:$0xff] }
   0x3   :  { %v30_v6 = vld [vmem:[%s260_s1 + $0x48] sm:$0xff]  ;;  %v29_v7 = vld [vmem:[%s260_s1 + $0x40] sm:$0xff]  ;;  %v28_v8 = vld [vmem:[%s260_s1 + $0x38] sm:$0xff] }
   0x4   :  { %v27_v9 = vld [vmem:[%s260_s1 + $0x30] sm:$0xff]  ;;  %v26_v10 = vld [vmem:[%s260_s1 + $0x28] sm:$0xff]  ;;  %v25_v11 = vld [vmem:[%s260_s1 + $0x20] sm:$0xff] }
   0x5   :  { %v24_v12 = vld [vmem:[%s260_s1 + $0x18] sm:$0xff]  ;;  %v23_v13 = vld [vmem:[%s260_s1 + $0x10] sm:$0xff]  ;;  %v22_v14 = vld [vmem:[%s260_s1 + $0x8] sm:$0xff] }
   0x6   :  { %132 = vmatpush.xpose.msk.msra.mxu0 %vm44_vm0, %v35_v1  ;;  %v21_v15 = vld [vmem:[%s260_s1] sm:$0xff] }
   0x7   :  { %v40_v16 = vld [vmem:[%s262_s0] sm:$0xff] }
   0x8   :  { %v148_v17 = vld [vmem:[%s261_s2] ss:$0 sm:$0xff] }
   0x9   :  { %v149_v20 = vld [vmem:[%s263_s3] ss:$0 sm:$0xff] }
   0xa   :  { %133 = vmatpush.xpose.msk.msra.mxu0 %vm44_vm0, %v34_v2 }
   0xe   :  { %134 = vmatpush.xpose.msk.msra.mxu0 %vm44_vm0, %v33_v3 }
  0x12   :  { %135 = vmatpush.xpose.msk.msra.mxu0 %vm44_vm0, %v32_v4 }
  0x16   :  { %136 = vmatpush.xpose.msk.msra.mxu0 %vm44_vm0, %v31_v5 }
  0x1a   :  { %137 = vmatpush.xpose.msk.msra.mxu0 %vm44_vm0, %v30_v6 }
  0x1e   :  { %138 = vmatpush.xpose.msk.msra.mxu0 %vm44_vm0, %v29_v7 }
  0x22   :  { %139 = vmatpush.xpose.msk.msra.mxu0 %vm44_vm0, %v28_v8 }
  0x26   :  { %140 = vmatpush.xpose.msk.msra.mxu0 %vm44_vm0, %v27_v9 }
  0x2a   :  { %141 = vmatpush.xpose.msk.msra.mxu0 %vm44_vm0, %v26_v10 }
  0x2e   :  { %142 = vmatpush.xpose.msk.msra.mxu0 %vm44_vm0, %v25_v11 }
  0x32   :  { %143 = vmatpush.xpose.msk.msra.mxu0 %vm44_vm0, %v24_v12 }
  0x36   :  { %144 = vmatpush.xpose.msk.msra.mxu0 %vm44_vm0, %v23_v13 }
  0x3a   :  { %145 = vmatpush.xpose.msk.msra.mxu0 %vm44_vm0, %v22_v14 }
  0x3e   :  { %146 = vmatpush.xpose.msk.msra.mxu0 %vm44_vm0, %v21_v15 }
  0x41   :  { %147 = vmatmul.msk.f32.vlgmr.msra.gmra.mxu0 %vm44_vm0, %v40_v16 }
  0xbe   :  { %v113_v18 = vpop.f32.mrf.mxu0 }
  0xbf   :  { %v114_v19 = vadd.f32 %v148_v17, %v113_v18 }
  0xc1   :  { %v116_v21 = vmax.f32 %v114_v19, 0.0 }
  0xc3   :  { %v120_v22 = vmul.f32 %v149_v20, %v116_v21 }
  0xc5   :  { %121 = vadd.xlane.f32.xlu0 %v120_v22 }
 0x138   :  { %v122_v24 = vpop.xlane.xlu0 %121 }
 0x139   :  { %v124_v25 = vadd.f32 %v123_v23, %v122_v24 }
 0x13b   :  { %126 = vst.msk [vmem:[%s265_s5] sm:$0xff] %vm125_vm1, %v124_v25 }

</bundles_post_ra>
